<compile_context>
chip_gen: v7x
topology: tpu7x:2x2x1
jax: 0.10.0
libtpu: 0.0.40
codegen_flags: <defaults>
</compile_context>

<pallas_src>
import jax
import jax.numpy as jnp
from jax import lax
from jax.experimental import pallas as pl
from jax.experimental.pallas import tpu as pltpu


def _decatt_base_kernel(x1_ref, x2_ref, len_ref, w1_ref, w2_ref, bd_ref, o_ref):
    # x1_ref, x2_ref : (TB, S*D)  flattened per-sentence embeddings (lane-dense)
    # len_ref        : (TB, 2)    [lsize, rsize]
    # w1_ref, w2_ref : (1, S*D)   (W[0]-W[1]) halves, tiled across the seq axis
    # bd_ref         : (1, 1)     b[0] - b[1]
    # o_ref          : (TB, 1)    p0 = softmax(logits)[:, 0]

    # Weighted reduce over the flattened (seq, feature) lane axis:
    # VPU multiply + XLU cross-lane reduce, exact f32 (compute hides under DMA).
    sL = jnp.sum(x1_ref[...] * w1_ref[...], axis=-1, keepdims=True)   # (TB, 1)
    sR = jnp.sum(x2_ref[...] * w2_ref[...], axis=-1, keepdims=True)   # (TB, 1)

    # Length normalization folded into the logit difference.
    # (approx=False keeps the 1e-5 agreement with the f32 reference.)
    inv = pl.reciprocal(len_ref[...], approx=False)                   # (TB, 2)
    d = sL * inv[:, 0:1] + sR * inv[:, 1:2] + bd_ref[...]             # (TB, 1)

    # softmax([l0, l1])[:, 0] == sigmoid(l0 - l1)  (EUP exp, no XLU max/sum
    # over a 2-wide axis).  Padded tail rows of a partial last block may be
    # garbage/inf; they are row-independent and never written back past B.
    o_ref[...] = 1.0 / (1.0 + jnp.exp(-d))


def _vmem_tile_budget_bytes():
    # ~3/8 of physical VMEM for the pipelined batch tiles: 24 MiB on v7x
    # (64 MiB), 48 MiB on v5e/v6e (128 MiB); leaves headroom for the
    # compiler's own scratch plus the resident weight/length/output tiles.
    try:
        cap = pltpu.get_tpu_info().vmem_capacity_bytes
    except Exception:  # older jax / query unavailable -> assume strictest chip
        cap = 64 * 1024 * 1024
    return (cap * 3) // 8


def _choose_block_b(B, lane_width, budget_bytes):
    # VMEM per batch row: 2 streamed inputs x 2 pipeline buffers + ~2 live
    # (TB, S*D) compute temporaries (the x*w products), all f32.
    bytes_per_row = (2 * 2 + 2) * lane_width * 4
    cap = max(8, (budget_bytes // bytes_per_row) // 8 * 8)
    if B > cap:
        return cap                        # stream the batch in budget-sized tiles
    if B >= 512:
        # Whole batch fits, but split into two tiles so the "parallel" grid
        # axis can shard across v7x's two TensorCores.
        return min(cap, (((B + 1) // 2) + 7) // 8 * 8)
    return B                              # single full-batch tile when tiny


def decatt_base_forward(sent1_emb, sent2_emb, lsize, rsize, weight, bias,
                        *, block_b=None):
    """
    sent1_emb, sent2_emb : (B, S, D) float32 embedded sentences
    lsize, rsize         : (B,) float32 sentence lengths (>= 1)
    weight               : (2, 2*D) float32  (PyTorch nn.Linear convention)
    bias                 : (2,) float32
    returns              : (B, 2) float32 softmax probabilities
    """
    B, S, D = sent1_emb.shape
    C = weight.shape[0]
    assert C == 2 and weight.shape[1] == 2 * D

    L = S * D
    # Free row-major reshapes: gather outputs stream straight into the kernel,
    # lane-dense, with no concatenate / extra HBM round-trip.
    x1 = sent1_emb.reshape(B, L).astype(jnp.float32)
    x2 = sent2_emb.reshape(B, L).astype(jnp.float32)
    lens = jnp.stack([lsize, rsize], axis=-1).astype(jnp.float32)      # (B, 2)

    # 2-class head reduced to its logit-difference form; weight halves tiled
    # across S so the kernel reduces over the flattened lane axis.
    wd = (weight[0] - weight[1]).astype(jnp.float32)                   # (2D,)
    w1 = jnp.tile(wd[:D], S).reshape(1, L)
    w2 = jnp.tile(wd[D:], S).reshape(1, L)
    bd = (bias[0] - bias[1]).reshape(1, 1).astype(jnp.float32)

    budget = _vmem_tile_budget_bytes()
    if block_b is None:
        block_b = _choose_block_b(B, L, budget)
    grid = (pl.cdiv(B, block_b),)

    cost = pl.CostEstimate(
        flops=B * (4 * L + 6),
        transcendentals=B,
        bytes_accessed=4 * (2 * B * L + 2 * B + 2 * L + 1 + B),
    )

    p0 = pl.pallas_call(
        _decatt_base_kernel,
        out_shape=jax.ShapeDtypeStruct((B, 1), jnp.float32),
        grid=grid,
        in_specs=[
            pl.BlockSpec((block_b, L), lambda i: (i, 0)),   # streamed, lane-dense
            pl.BlockSpec((block_b, L), lambda i: (i, 0)),   # streamed, lane-dense
            pl.BlockSpec((block_b, 2), lambda i: (i, 0)),   # streamed (tiny)
            pl.BlockSpec((1, L), lambda i: (0, 0)),         # resident
            pl.BlockSpec((1, L), lambda i: (0, 0)),         # resident
            pl.BlockSpec((1, 1), lambda i: (0, 0)),         # resident
        ],
        out_specs=pl.BlockSpec((block_b, 1), lambda i: (i, 0)),
        compiler_params=pltpu.CompilerParams(
            dimension_semantics=("parallel",),              # shards tiles on v7x TCs
            vmem_limit_bytes=budget + 16 * 1024 * 1024,
        ),
        cost_estimate=cost,
    )(x1, x2, lens, w1, w2, bd)

    # p1 = 1 - p0 for the 2-class softmax; tiny XLA op on (B, 1).
    return jnp.concatenate([p0, 1.0 - p0], axis=1)


if __name__ == "__main__":
    # Small, deterministic synthetic config consistent with the module.
    batch = 2
    seq = 8
    vocab_size = 64
    embedding_dim = 32          # embedding_size == vocab.vectors dim
    num_classes = 2             # nn.Linear(2 * embedding_size, 2)
    max_sentence_length = 30    # unused by forward, kept for fidelity

    key = jax.random.PRNGKey(0)
    k_emb, k_w, k_b, k_s1, k_s2, k_l, k_r = jax.random.split(key, 7)

    # Frozen "vocab.vectors" embedding table.
    embedding_table = jax.random.normal(k_emb, (vocab_size, embedding_dim),
                                        dtype=jnp.float32)
    # linear_layer = nn.Linear(2 * embedding_size, 2)
    lin_weight = jax.random.normal(k_w, (num_classes, 2 * embedding_dim),
                                   dtype=jnp.float32) * 0.1
    lin_bias = jax.random.normal(k_b, (num_classes,), dtype=jnp.float32) * 0.1

    # Token inputs and sentence lengths.
    sent1 = jax.random.randint(k_s1, (batch, seq), 0, vocab_size)
    sent2 = jax.random.randint(k_s2, (batch, seq), 0, vocab_size)
    lsize_list = jax.random.randint(k_l, (batch,), 1, seq + 1).astype(jnp.float32)
    rsize_list = jax.random.randint(k_r, (batch,), 1, seq + 1).astype(jnp.float32)

    # Embedding lookup (gather) in plain JAX — glue around the kernel.
    sent1_emb = jnp.take(embedding_table, sent1, axis=0)   # (B, S, D)
    sent2_emb = jnp.take(embedding_table, sent2, axis=0)   # (B, S, D)

    out = decatt_base_forward(sent1_emb, sent2_emb, lsize_list, rsize_list,
                              lin_weight, lin_bias)
    out = jax.block_until_ready(out)

    # Pure-JAX reference check (same semantics as the PyTorch forward).
    s1_avg = jnp.sum(sent1_emb, axis=1) / lsize_list[:, None]
    s2_avg = jnp.sum(sent2_emb, axis=1) / rsize_list[:, None]
    logits = jnp.matmul(jnp.concatenate([s1_avg, s2_avg], axis=1), lin_weight.T,
                        precision=lax.Precision.HIGHEST) + lin_bias
    ref = jax.nn.softmax(logits, axis=1)
    assert out.shape == (batch, num_classes)
    assert jnp.allclose(out, ref, atol=1e-5, rtol=1e-5), (out, ref)

    print("KERNEL_OK")
</pallas_src>

<mosaic_0001>
module attributes {stable_mosaic.version = 11 : i64} {
  func.func @_decatt_base_kernel(%arg0: i32, %arg1: memref<2x256xf32, #tpu.memory_space<vmem>>, %arg2: memref<2x256xf32, #tpu.memory_space<vmem>>, %arg3: memref<2x2xf32, #tpu.memory_space<vmem>>, %arg4: memref<1x256xf32, #tpu.memory_space<vmem>>, %arg5: memref<1x256xf32, #tpu.memory_space<vmem>>, %arg6: memref<1x1xf32, #tpu.memory_space<vmem>>, %arg7: memref<2x1xf32, #tpu.memory_space<vmem>>) attributes {dimension_semantics = [#tpu.dimension_semantics<parallel>], iteration_bounds = array<i64: 1>, scalar_prefetch = 0 : i64, scratch_operands = 0 : i64, tpu.core_type = #tpu.core_type<tc>, window_params = [{transform_indices = @transform_0, window_bounds = array<i64: 2, 256>}, {transform_indices = @transform_1, window_bounds = array<i64: 2, 256>}, {transform_indices = @transform_2, window_bounds = array<i64: 2, 2>}, {pipeline_mode = #tpu.pipeline_mode<synchronous>, transform_indices = @transform_3, window_bounds = array<i64: 1, 256>}, {pipeline_mode = #tpu.pipeline_mode<synchronous>, transform_indices = @transform_4, window_bounds = array<i64: 1, 256>}, {pipeline_mode = #tpu.pipeline_mode<synchronous>, transform_indices = @transform_5, window_bounds = array<i64: 1, 1>}, {transform_indices = @transform_6, window_bounds = array<i64: 2, 1>}]} {
    %c0 = arith.constant 0 : index
    %c0_0 = arith.constant 0 : index
    %0 = vector.load %arg1[%c0, %c0_0] : memref<2x256xf32, #tpu.memory_space<vmem>>, vector<2x256xf32>
    %c0_1 = arith.constant 0 : index
    %c0_2 = arith.constant 0 : index
    %1 = vector.load %arg4[%c0_1, %c0_2] : memref<1x256xf32, #tpu.memory_space<vmem>>, vector<1x256xf32>
    %2 = vector.broadcast %1 : vector<1x256xf32> to vector<2x256xf32>
    %3 = arith.mulf %0, %2 : vector<2x256xf32>
    %cst = arith.constant dense<0.000000e+00> : vector<2xf32>
    %4 = vector.multi_reduction <add>, %3, %cst [1] : vector<2x256xf32> to vector<2xf32>
    %5 = vector.shape_cast %4 : vector<2xf32> to vector<2x1xf32>
    %c0_3 = arith.constant 0 : index
    %c0_4 = arith.constant 0 : index
    %6 = vector.load %arg2[%c0_3, %c0_4] : memref<2x256xf32, #tpu.memory_space<vmem>>, vector<2x256xf32>
    %c0_5 = arith.constant 0 : index
    %c0_6 = arith.constant 0 : index
    %7 = vector.load %arg5[%c0_5, %c0_6] : memref<1x256xf32, #tpu.memory_space<vmem>>, vector<1x256xf32>
    %8 = vector.broadcast %7 : vector<1x256xf32> to vector<2x256xf32>
    %9 = arith.mulf %6, %8 : vector<2x256xf32>
    %cst_7 = arith.constant dense<0.000000e+00> : vector<2xf32>
    %10 = vector.multi_reduction <add>, %9, %cst_7 [1] : vector<2x256xf32> to vector<2xf32>
    %11 = vector.shape_cast %10 : vector<2xf32> to vector<2x1xf32>
    %c0_8 = arith.constant 0 : index
    %c0_9 = arith.constant 0 : index
    %12 = vector.load %arg3[%c0_8, %c0_9] : memref<2x2xf32, #tpu.memory_space<vmem>>, vector<2x2xf32>
    %13 = tpu.reciprocal %12 : vector<2x2xf32> -> vector<2x2xf32>
    %14 = vector.extract_strided_slice %13 {offsets = [0, 0], sizes = [2, 1], strides = [1, 1]} : vector<2x2xf32> to vector<2x1xf32>
    %15 = arith.mulf %5, %14 : vector<2x1xf32>
    %16 = vector.extract_strided_slice %13 {offsets = [0, 1], sizes = [2, 1], strides = [1, 1]} : vector<2x2xf32> to vector<2x1xf32>
    %17 = arith.mulf %11, %16 : vector<2x1xf32>
    %18 = arith.addf %15, %17 : vector<2x1xf32>
    %c0_10 = arith.constant 0 : index
    %c0_11 = arith.constant 0 : index
    %19 = vector.load %arg6[%c0_10, %c0_11] : memref<1x1xf32, #tpu.memory_space<vmem>>, vector<1x1xf32>
    %20 = vector.broadcast %19 : vector<1x1xf32> to vector<2x1xf32>
    %21 = arith.addf %18, %20 : vector<2x1xf32>
    %cst_12 = arith.constant 0.000000e+00 : f32
    %22 = vector.broadcast %cst_12 : f32 to vector<2x1xf32>
    %23 = arith.subf %22, %21 : vector<2x1xf32>
    %24 = math.exp %23 : vector<2x1xf32>
    %cst_13 = arith.constant 1.000000e+00 : f32
    %25 = vector.broadcast %cst_13 : f32 to vector<2x1xf32>
    %26 = arith.addf %25, %24 : vector<2x1xf32>
    %cst_14 = arith.constant 1.000000e+00 : f32
    %27 = vector.broadcast %cst_14 : f32 to vector<2x1xf32>
    %28 = arith.divf %27, %26 : vector<2x1xf32>
    %c0_15 = arith.constant 0 : index
    %c0_16 = arith.constant 0 : index
    %29 = vector.load %arg7[%c0_15, %c0_16] : memref<2x1xf32, #tpu.memory_space<vmem>>, vector<2x1xf32>
    tpu.vector_store %arg7[%c0_15, %c0_16], %28 {strides = array<i32>} : memref<2x1xf32, #tpu.memory_space<vmem>>, vector<2x1xf32>,
    return
  }
  func.func @transform_0(%arg0: i32) -> (i32, i32) {
    %c0_i32 = arith.constant 0 : i32
    %c0_i32_0 = arith.constant 0 : i32
    return %arg0, %c0_i32 : i32, i32
  }
  func.func @transform_1(%arg0: i32) -> (i32, i32) {
    %c0_i32 = arith.constant 0 : i32
    %c0_i32_0 = arith.constant 0 : i32
    return %arg0, %c0_i32 : i32, i32
  }
  func.func @transform_2(%arg0: i32) -> (i32, i32) {
    %c0_i32 = arith.constant 0 : i32
    %c0_i32_0 = arith.constant 0 : i32
    return %arg0, %c0_i32 : i32, i32
  }
  func.func @transform_3(%arg0: i32) -> (i32, i32) {
    %c0_i32 = arith.constant 0 : i32
    %c0_i32_0 = arith.constant 0 : i32
    %c0_i32_1 = arith.constant 0 : i32
    return %c0_i32, %c0_i32_0 : i32, i32
  }
  func.func @transform_4(%arg0: i32) -> (i32, i32) {
    %c0_i32 = arith.constant 0 : i32
    %c0_i32_0 = arith.constant 0 : i32
    %c0_i32_1 = arith.constant 0 : i32
    return %c0_i32, %c0_i32_0 : i32, i32
  }
  func.func @transform_5(%arg0: i32) -> (i32, i32) {
    %c0_i32 = arith.constant 0 : i32
    %c0_i32_0 = arith.constant 0 : i32
    %c0_i32_1 = arith.constant 0 : i32
    return %c0_i32, %c0_i32_0 : i32, i32
  }
  func.func @transform_6(%arg0: i32) -> (i32, i32) {
    %c0_i32 = arith.constant 0 : i32
    %c0_i32_0 = arith.constant 0 : i32
    return %arg0, %c0_i32 : i32, i32
  }
}

</mosaic_0001>

<bundles_post_ra>
// kernel: tpu_custom_call.1
= control target key start
LH: loop header
LB: loop body
LE: loop exit
PB: predicated region body
PF: predicated region fallthrough
CT: control target
= control target key end

     0   :  { %s244_s0 = inlined_call_operand.hbm [shape: f32[2,256], index: 0, kind: input, shape index: {}]   ;;  %s245_s1 = inlined_call_operand.vmem [shape: f32[2,256], index: 1, kind: input, shape index: {}]   ;;  %s246_s2 = inlined_call_operand.vmem [shape: f32[2,2], index: 2, kind: input, shape index: {}]   ;;  %s247_s3 = inlined_call_operand.vmem [shape: f32[1,256], index: 3, kind: input, shape index: {}]   ;;  %s248_s4 = inlined_call_operand.vmem [shape: f32[1,256], index: 4, kind: input, shape index: {}]   ;;  %s249_s5 = inlined_call_operand.<no memory space> [shape: f32[1,1], index: 5, kind: input, shape index: {}]   ;;  %s250_s6 = inlined_call_operand.vmem [shape: f32[2,1], index: 6, kind: output, shape index: {}]  }
   0x1   :  { %v11_v0 = vstv %s249_s5 }
   0x2   :  { %12 = vst [vmem:[#allocation2] sm:$0x1] %v11_v0 }
   0x3   :  { %13 = vsyncpa [#allocation4], 0  ;;  %s176_s23 = smov [#allocation3]   ;;  %s152_s27 = scalar_lea.hbm %s244_s0, 64 }
   0x4   :  { %s20_s24 = sshll.u32 %s176_s23, 4  ;;  %p153_p0 = scmp.ne.s32.totalorder %s244_s0, %s152_s27  ;;  %s21_s24 = int_to_ptr.vmem [resolvable:$true] %s20_s24 }
   0x5   :  { %p156_p1 = scmp.lt.u32.totalorder %s152_s27, %s244_s0 }
   0x7   :  { %p158_p2 = pnand %p156_p1, %p153_p0 }
   0x9   :  { %161 = shalt.err (!%p158_p2)
}
   0xa   :  { %s162_s5 = scalar_lea.vmem %s21_s24, 64  ;;  %p167_p4 = scmp.lt.s32.totalorder %s21_s24, %s21_s24 }
   0xb   :  { %p163_p3 = scmp.ne.s32.totalorder %s21_s24, %s162_s5  ;;  %p168_p5 = scmp.lt.s32.totalorder %s162_s5, %s162_s5 }
   0xd   :  { %p169_p6 = por %p168_p5, %p167_p4 }
   0xf   :  { %p170_p7 = pnand %p169_p6, %p163_p3 }
  0x11   :  { %173 = shalt.err (!%p170_p7)
}
  0x12   :  { %23 = dma.hbm_to_vmem [thread:$0]  %s244_s0, 64, %s21_s24, [#allocation4]  }
  0x13   :  { %174 = dma.done.wait [#allocation4], 64  }
  0x14   :  { %175 = vsyncadd [#allocation4], 4294967232  ;;  %v40_v1 = vlaneseq  ;;  %v177_v2 = vmov 1983009808   ;;  %v76_v8 = vld [vmem:[%s248_s4] sm:$0x3] }
  0x15   :  { %v50_v3 = vunpack.c.l.s4 %v177_v2  ;;  %v38_v12 = vld [vmem:[%s247_s3] sm:$0x3]  ;;  %vm69_vm0 = vcmask 1041408   ;;  %s178_s4 = smov 127   ;;  %vm135_vm1 = vcmask 1024  }
  0x16   :  { %v41_v4 = vshrl.u32 %v40_v1, 7  ;;  %v75_v16 = vld [vmem:[%s245_s1] sm:$0xf] }
  0x17   :  { %v51_v7 = vunpack.c.0.s8 %v50_v3  ;;  %v37_v19 = vld [vmem:[#allocation3] sm:$0xf]  ;;  %v142_v39 = vld [vmem:[#allocation2] ss:$0 sm:$0xff] }
  0x18   :  { %v42_v5 = vsub.s32 0, %v41_v4  ;;  %v46_v6 = vsub.s32 1, %v41_v4  ;;  %v112_v33 = vld [vmem:[%s246_s2] sm:$0x3] }
  0x19   :  { %v54_v9 = vsub.s32 %v51_v7, %v41_v4  ;;  %146 = vrcp.f32 %v112_v33 }
  0x1a   :  { %v81_v10 = vrot.slane %v76_v8, %v42_v5  ;;  %v85_v11 = vrot.slane %v76_v8, %v46_v6  ;;  %v43_v13 = vrot.slane %v38_v12, %v42_v5  ;;  %v47_v14 = vrot.slane %v38_v12, %v46_v6 }
  0x1c   :  { %v86_v15 = vcombine.low %v81_v10, %v85_v11  ;;  %v48_v17 = vcombine.low %v43_v13, %v47_v14 }
  0x1e   :  { %v93_v18 = vrot.slane %v86_v15, %v54_v9  ;;  %v55_v20 = vrot.slane %v48_v17, %v54_v9 }
  0x20   :  { %v95_v21 = vmul.f32 %v93_v18, %v75_v16  ;;  %v57_v22 = vmul.f32 %v55_v20, %v37_v19 }
  0x22   :  { %v103_v23 = vrot.slane %v95_v21, %v54_v9  ;;  %v65_v24 = vrot.slane %v57_v22, %v54_v9 }
  0x23   :  { %v147_v34 = vpop.eup %146 }
  0x24   :  { %v104_v25 = vcombine.high %v103_v23, %v103_v23  ;;  %v107_v26 = vsel %vm69_vm0, %v103_v23, 0.0  ;;  %v66_v27 = vcombine.high %v65_v24, %v65_v24  ;;  %v70_v29 = vsel %vm69_vm0, %v65_v24, 0.0 }
  0x26   :  { %v108_v28 = vsel %vm69_vm0, %v104_v25, 0.0  ;;  %v71_v31 = vsel %vm69_vm0, %v66_v27, 0.0 }
  0x27   :  { %v109_v30 = vadd.f32 %v108_v28, %v107_v26  ;;  %v72_v32 = vadd.f32 %v71_v31, %v70_v29 }
  0x29   :  { %110 = vadd.xlane.f32.xlu0 %v109_v30 }
  0x2d   :  { %73 = vadd.xlane.f32.xlu0 %v72_v32 }
  0xb6   :  { %v111_v35 = vpop.xlane.xlu0 %110 }
  0xb7   :  { %v115_v36 = vmul.f32 %v147_v34, %v111_v35 }
  0xb9   :  { %117 = vrot.lane.b32.xlu1 %v115_v36, %s178_s4 }
  0xba   :  { %v74_v37 = vpop.xlane.xlu0 %73 }
  0xbb   :  { %v114_v38 = vmul.f32 %v147_v34, %v74_v37 }
 0x12b   :  { %v118_v40 = vpop.permute.xlu1 %117 }
 0x12c   :  { %v120_v41 = vadd.f32 %v118_v40, %v114_v38 }
 0x12e   :  { %v128_v42 = vadd.f32 %v142_v39, %v120_v41 }
 0x130   :  { %v129_v43 = vsub.f32 0.0, %v128_v42 }
 0x132   :  { %v130_v44 = vmul.f32 1.442695, %v129_v43 }
 0x134   :  { %148 = vpow2.f32 %v130_v44 }
 0x13e   :  { %v149_v45 = vpop.eup %148 }
 0x13f   :  { %v132_v46 = vadd.f32 1.0, %v149_v45 }
 0x141   :  { %150 = vrcp.f32 %v132_v46 }
 0x14b   :  { %v151_v47 = vpop.eup %150 }
 0x14c   :  { %136 = vst.msk [vmem:[%s250_s6] sm:$0x3] %vm135_vm1, %v151_v47 }
 0x14d   :  { %141 = vsyncpa [#allocation4], 1 }

</bundles_post_ra>
